<compile_context>
chip_gen: v5e
topology: v5e:2x2
jax: 0.10.0
libtpu: 0.0.40
codegen_flags: <defaults>
</compile_context>

<pallas_src>
import functools

import jax
import jax.numpy as jnp
from jax.experimental import pallas as pl
from jax.experimental.pallas import tpu as pltpu

_VMEM_LIMIT_BYTES = 32 * 1024 * 1024        # safe cap on v5e/v6e/v7x
_WEIGHT_RESIDENT_BUDGET = 8 * 1024 * 1024   # padded W bytes to keep VMEM-resident


def _round_up(n, m):
    return ((n + m - 1) // m) * m


def _pad_to(a, shape):
    pads = [(0, t - s) for s, t in zip(a.shape, shape)]
    if all(p == (0, 0) for p in pads):
        return a
    return jnp.pad(a, pads)


def _chip_tiles():
    """Tile defaults matched to the MXU width of the local chip."""
    try:
        kind = jax.devices()[0].device_kind.lower()
    except Exception:  # pragma: no cover - non-TPU fallback
        kind = ""
    if "v5" in kind or "v4" in kind:
        return 128, 128, 512    # 128-wide MXU
    return 256, 256, 512        # v6e / v7x: 2x256x256 MXU


# --------------------------------------------------------------------------
# Kernels
# --------------------------------------------------------------------------
def _linear_resident_kernel(x_ref, w_ref, b_ref, o_ref):
    # x_ref: [tm, Dp]; w_ref: [Cp, Dp] (native nn.Linear layout, VMEM-resident);
    # b_ref: [1, Cp].  Contract last dims of both operands on the MXU.
    acc = jax.lax.dot_general(
        x_ref[...], w_ref[...],
        dimension_numbers=(((1,), (1,)), ((), ())),
        preferred_element_type=jnp.float32)
    o_ref[...] = (acc + b_ref[...]).astype(o_ref.dtype)


def _linear_tiled_kernel(x_ref, w_ref, b_ref, o_ref, acc_ref):
    k = pl.program_id(2)

    @pl.when(k == 0)
    def _():
        acc_ref[...] = jnp.zeros_like(acc_ref)

    acc_ref[...] += jax.lax.dot_general(
        x_ref[...], w_ref[...],
        dimension_numbers=(((1,), (1,)), ((), ())),
        preferred_element_type=jnp.float32)

    @pl.when(k == pl.num_programs(2) - 1)
    def _():
        o_ref[...] = (acc_ref[...] + b_ref[...]).astype(o_ref.dtype)


# --------------------------------------------------------------------------
# Pallas dispatch (always uses the kernel)
# --------------------------------------------------------------------------
@functools.partial(jax.jit, static_argnames=("tm", "tn", "tk", "use_bf16"))
def _linear_pallas(x, weight, bias, *, tm, tn, tk, use_bf16):
    B, D = x.shape
    C, _ = weight.shape
    out_dtype = x.dtype
    out_itemsize = jnp.dtype(out_dtype).itemsize

    mm_dtype = jnp.bfloat16 if use_bf16 else x.dtype
    itemsize = jnp.dtype(mm_dtype).itemsize
    x_in = x.astype(mm_dtype)
    w_in = weight.astype(mm_dtype)                      # native [C, D] layout
    b_in = bias.astype(jnp.float32).reshape(1, C)

    # Clamp tiles to the problem so small shapes don't pad to 256.
    tm_ = min(tm, _round_up(B, 8))
    tn_ = min(tn, _round_up(C, 128))
    Bp = _round_up(B, tm_)
    Cp = _round_up(C, tn_)

    weight_resident = (Cp * D * itemsize) <= _WEIGHT_RESIDENT_BUDGET

    if weight_resident:
        # --- Path A: weight held resident in VMEM, batch-only grid. ---------
        Dp = D                                           # full-dim block: no K pad needed
        xp = _pad_to(x_in, (Bp, Dp))
        wp = _pad_to(w_in, (Cp, Dp))
        bp = _pad_to(b_in, (1, Cp))

        cost = pl.CostEstimate(
            flops=2 * Bp * Dp * Cp,
            transcendentals=0,
            bytes_accessed=(Bp * Dp + Cp * Dp) * itemsize
            + Cp * 4 + Bp * Cp * out_itemsize,
        )
        out_p = pl.pallas_call(
            _linear_resident_kernel,
            out_shape=jax.ShapeDtypeStruct((Bp, Cp), out_dtype),
            grid_spec=pltpu.PrefetchScalarGridSpec(
                num_scalar_prefetch=0,
                grid=(Bp // tm_,),
                in_specs=[
                    pl.BlockSpec((tm_, Dp), lambda i: (i, 0)),
                    pl.BlockSpec((Cp, Dp), lambda i: (0, 0)),   # constant -> resident
                    pl.BlockSpec((1, Cp), lambda i: (0, 0)),    # constant -> resident
                ],
                out_specs=pl.BlockSpec((tm_, Cp), lambda i: (i, 0)),
            ),
            compiler_params=pltpu.CompilerParams(
                dimension_semantics=("parallel",),
                vmem_limit_bytes=_VMEM_LIMIT_BYTES,
            ),
            cost_estimate=cost,
        )(xp, wp, bp)
        return out_p[:B, :C]

    # --- Path B: tiled K-loop for heads too large to hold resident. ---------
    tk_ = min(tk, _round_up(D, 128))
    Dp = _round_up(D, tk_)
    xp = _pad_to(x_in, (Bp, Dp))
    wp = _pad_to(w_in, (Cp, Dp))
    bp = _pad_to(b_in, (1, Cp))

    cost = pl.CostEstimate(
        flops=2 * Bp * Dp * Cp,
        transcendentals=0,
        bytes_accessed=(Bp * Dp + Cp * Dp) * itemsize
        + Cp * 4 + Bp * Cp * out_itemsize,
    )
    out_p = pl.pallas_call(
        _linear_tiled_kernel,
        out_shape=jax.ShapeDtypeStruct((Bp, Cp), out_dtype),
        grid_spec=pltpu.PrefetchScalarGridSpec(
            num_scalar_prefetch=0,
            grid=(Bp // tm_, Cp // tn_, Dp // tk_),
            in_specs=[
                pl.BlockSpec((tm_, tk_), lambda i, j, k: (i, k)),
                pl.BlockSpec((tn_, tk_), lambda i, j, k: (j, k)),  # native [C, D]
                pl.BlockSpec((1, tn_), lambda i, j, k: (0, j)),
            ],
            out_specs=pl.BlockSpec((tm_, tn_), lambda i, j, k: (i, j)),
            scratch_shapes=[pltpu.VMEM((tm_, tn_), jnp.float32)],
        ),
        compiler_params=pltpu.CompilerParams(
            dimension_semantics=("parallel", "parallel", "arbitrary"),
            vmem_limit_bytes=_VMEM_LIMIT_BYTES,
        ),
        cost_estimate=cost,
    )(xp, wp, bp)
    return out_p[:B, :C]


# --------------------------------------------------------------------------
# Public wrapper (ProxyWrapper.forward semantics)
# --------------------------------------------------------------------------
def proxy_wrapper_forward(x, weight, bias, *, use_bf16=True, force_pallas=False,
                          tm=None, tn=None, tk=None):
    """classification_head(x) = x @ weight.T + bias.

    x:      [B, D]   already-flattened features
    weight: [C, D]   PyTorch nn.Linear layout (NOT transposed in HBM)
    bias:   [C]
    returns [B, C] in x.dtype
    """
    B, D = x.shape
    C, D2 = weight.shape
    assert D == D2 and bias.shape == (C,)

    dm, dn, dk = _chip_tiles()
    tm = dm if tm is None else tm
    tn = dn if tn is None else tn
    tk = dk if tk is None else tk

    # Small-shape fallback: when padding would inflate MXU work by >~2x, a
    # bare XLA dot beats any standalone Pallas kernel (launch + per-step
    # overhead dominates).
    if not force_pallas and (B < 64 or C < 64 or D < 128):
        mm_dtype = jnp.bfloat16 if use_bf16 else x.dtype
        return (jnp.dot(x.astype(mm_dtype), weight.astype(mm_dtype).T,
                        preferred_element_type=jnp.float32)
                + bias.astype(jnp.float32)).astype(x.dtype)

    return _linear_pallas(x, weight, bias, tm=tm, tn=tn, tk=tk,
                          use_bf16=use_bf16)


if __name__ == "__main__":
    # Shapes consistent with the module: the wrapped model's last child is
    # nn.Linear(hidden=32, num_classes=16); x is a small batch of features.
    B, D, C = 8, 32, 16

    key = jax.random.PRNGKey(0)
    kx, kw, kb = jax.random.split(key, 3)

    x = jax.random.normal(kx, (B, D), dtype=jnp.float32)
    weight = jax.random.normal(kw, (C, D), dtype=jnp.float32) * 0.02   # [C, D]
    bias = jax.random.normal(kb, (C,), dtype=jnp.float32) * 0.01       # [C]

    ref = x @ weight.T + bias

    # Exercise the Pallas kernel (fp32 exact path, weight-resident branch).
    out = proxy_wrapper_forward(x, weight, bias, use_bf16=False,
                                force_pallas=True)
    out = jax.block_until_ready(out)
    assert out.shape == (B, C)
    assert jnp.allclose(out, ref, atol=1e-4, rtol=1e-4), "fp32 kernel mismatch"

    # Exercise the bf16 MXU fast path through the kernel as well.
    out_bf16 = jax.block_until_ready(
        proxy_wrapper_forward(x, weight, bias, use_bf16=True, force_pallas=True))
    assert jnp.allclose(out_bf16, ref, atol=2e-2, rtol=2e-2), "bf16 kernel mismatch"

    # Public entry point (small-shape fallback dispatch).
    out_pub = jax.block_until_ready(proxy_wrapper_forward(x, weight, bias))
    assert jnp.allclose(out_pub, ref, atol=2e-2, rtol=2e-2), "wrapper mismatch"

    print("KERNEL_OK")
</pallas_src>

<mosaic_0001>
module attributes {stable_mosaic.version = 11 : i64} {
  func.func @_linear_resident_kernel(%arg0: i32, %arg1: memref<8x32xf32, #tpu.memory_space<vmem>>, %arg2: memref<128x32xf32, #tpu.memory_space<vmem>>, %arg3: memref<1x128xf32, #tpu.memory_space<vmem>>, %arg4: memref<8x128xf32, #tpu.memory_space<vmem>>) attributes {dimension_semantics = [#tpu.dimension_semantics<parallel>], iteration_bounds = array<i64: 1>, scalar_prefetch = 0 : i64, scratch_operands = 0 : i64, tpu.core_type = #tpu.core_type<tc>, window_params = [{transform_indices = @transform_0, window_bounds = array<i64: 8, 32>}, {pipeline_mode = #tpu.pipeline_mode<synchronous>, transform_indices = @transform_1, window_bounds = array<i64: 128, 32>}, {pipeline_mode = #tpu.pipeline_mode<synchronous>, transform_indices = @transform_2, window_bounds = array<i64: 1, 128>}, {transform_indices = @transform_3, window_bounds = array<i64: 8, 128>}]} {
    %c0 = arith.constant 0 : index
    %c0_0 = arith.constant 0 : index
    %0 = vector.load %arg1[%c0, %c0_0] : memref<8x32xf32, #tpu.memory_space<vmem>>, vector<8x32xf32>
    %c0_1 = arith.constant 0 : index
    %c0_2 = arith.constant 0 : index
    %1 = vector.load %arg2[%c0_1, %c0_2] : memref<128x32xf32, #tpu.memory_space<vmem>>, vector<128x32xf32>
    %cst = arith.constant dense<0.000000e+00> : vector<8x128xf32>
    %2 = tpu.matmul %0, %1, %cst {dimension_numbers = #tpu.dot_dimension_numbers<[1], [1], [0], [0], [0, 0, 1, 0], [], []>} : vector<8x32xf32>, vector<128x32xf32>, vector<8x128xf32> -> vector<8x128xf32>
    %c0_3 = arith.constant 0 : index
    %c0_4 = arith.constant 0 : index
    %3 = vector.load %arg3[%c0_3, %c0_4] : memref<1x128xf32, #tpu.memory_space<vmem>>, vector<1x128xf32>
    %4 = vector.broadcast %3 : vector<1x128xf32> to vector<8x128xf32>
    %5 = arith.addf %2, %4 : vector<8x128xf32>
    %c0_5 = arith.constant 0 : index
    %c0_6 = arith.constant 0 : index
    %6 = vector.load %arg4[%c0_5, %c0_6] : memref<8x128xf32, #tpu.memory_space<vmem>>, vector<8x128xf32>
    tpu.vector_store %arg4[%c0_5, %c0_6], %5 {strides = array<i32>} : memref<8x128xf32, #tpu.memory_space<vmem>>, vector<8x128xf32>,
    return
  }
  func.func @transform_0(%arg0: i32) -> (i32, i32) {
    %c0_i32 = arith.constant 0 : i32
    %c0_i32_0 = arith.constant 0 : i32
    return %arg0, %c0_i32 : i32, i32
  }
  func.func @transform_1(%arg0: i32) -> (i32, i32) {
    %c0_i32 = arith.constant 0 : i32
    %c0_i32_0 = arith.constant 0 : i32
    %c0_i32_1 = arith.constant 0 : i32
    return %c0_i32, %c0_i32_0 : i32, i32
  }
  func.func @transform_2(%arg0: i32) -> (i32, i32) {
    %c0_i32 = arith.constant 0 : i32
    %c0_i32_0 = arith.constant 0 : i32
    %c0_i32_1 = arith.constant 0 : i32
    return %c0_i32, %c0_i32_0 : i32, i32
  }
  func.func @transform_3(%arg0: i32) -> (i32, i32) {
    %c0_i32 = arith.constant 0 : i32
    %c0_i32_0 = arith.constant 0 : i32
    return %arg0, %c0_i32 : i32, i32
  }
}

</mosaic_0001>

<bundles_post_ra>
// kernel: _linear_pallas.1
= control target key start
LH: loop header
LB: loop body
LE: loop exit
PB: predicated region body
PF: predicated region fallthrough
CT: control target
= control target key end

     0   :  { %vm36_vm0 = vcmask 261120   ;;  %s265_s0 = inlined_call_operand.vmem [shape: f32[8,32], index: 0, kind: input, shape index: {}]   ;;  %s266_s1 = inlined_call_operand.vmem [shape: f32[128,32], index: 1, kind: input, shape index: {}]   ;;  %s267_s2 = inlined_call_operand.vmem [shape: f32[1,128], index: 2, kind: input, shape index: {}]   ;;  %s268_s3 = inlined_call_operand.hbm [shape: f32[8,128], index: 3, kind: output, shape index: {}]  }
   0x1   :  { %v31_v0 = vld [vmem:[%s266_s1 + $0x78] sm:$0xff]  ;;  %v30_v1 = vld [vmem:[%s266_s1 + $0x70] sm:$0xff] }
   0x2   :  { %125 = vmatpush.xpose.msk.msra.mxu0 %vm36_vm0, %v31_v0 }
   0x3   :  { %8 = vsyncpa [#allocation3], 0  ;;  %v29_v2 = vld [vmem:[%s266_s1 + $0x68] sm:$0xff]  ;;  %v28_v3 = vld [vmem:[%s266_s1 + $0x60] sm:$0xff]  ;;  %s170_s21 = smov [#allocation2]   ;;  %s116_s25 = sshll.u32 %s268_s3, 4  ;;  %s117_s25 = int_to_ptr.hbm [resolvable:$true] %s116_s25 }
   0x4   :  { %v27_v4 = vld [vmem:[%s266_s1 + $0x58] sm:$0xff]  ;;  %v26_v5 = vld [vmem:[%s266_s1 + $0x50] sm:$0xff]  ;;  %v25_v6 = vld [vmem:[%s266_s1 + $0x48] sm:$0xff]  ;;  %s114_s22 = sshll.u32 %s170_s21, 4  ;;  %s115_s22 = int_to_ptr.vmem [resolvable:$true] %s114_s22 }
   0x5   :  { %v24_v7 = vld [vmem:[%s266_s1 + $0x40] sm:$0xff]  ;;  %v23_v8 = vld [vmem:[%s266_s1 + $0x38] sm:$0xff]  ;;  %v22_v9 = vld [vmem:[%s266_s1 + $0x30] sm:$0xff] }
   0x6   :  { %126 = vmatpush.xpose.msk.msra.mxu0 %vm36_vm0, %v30_v1  ;;  %v21_v10 = vld [vmem:[%s266_s1 + $0x28] sm:$0xff]  ;;  %v20_v11 = vld [vmem:[%s266_s1 + $0x20] sm:$0xff]  ;;  %v19_v12 = vld [vmem:[%s266_s1 + $0x18] sm:$0xff] }
   0x7   :  { %v18_v13 = vld [vmem:[%s266_s1 + $0x10] sm:$0xff]  ;;  %v17_v14 = vld [vmem:[%s266_s1 + $0x8] sm:$0xff]  ;;  %v16_v15 = vld [vmem:[%s266_s1] sm:$0xff] }
   0x8   :  { %v15_v16 = vld [vmem:[%s265_s0] sm:$0xff] }
   0x9   :  { %v143_v17 = vld [vmem:[%s267_s2] ss:$0 sm:$0xff] }
   0xa   :  { %127 = vmatpush.xpose.msk.msra.mxu0 %vm36_vm0, %v29_v2 }
   0xe   :  { %128 = vmatpush.xpose.msk.msra.mxu0 %vm36_vm0, %v28_v3 }
  0x12   :  { %129 = vmatpush.xpose.msk.msra.mxu0 %vm36_vm0, %v27_v4 }
  0x16   :  { %130 = vmatpush.xpose.msk.msra.mxu0 %vm36_vm0, %v26_v5 }
  0x1a   :  { %131 = vmatpush.xpose.msk.msra.mxu0 %vm36_vm0, %v25_v6 }
  0x1e   :  { %132 = vmatpush.xpose.msk.msra.mxu0 %vm36_vm0, %v24_v7 }
  0x22   :  { %133 = vmatpush.xpose.msk.msra.mxu0 %vm36_vm0, %v23_v8 }
  0x26   :  { %134 = vmatpush.xpose.msk.msra.mxu0 %vm36_vm0, %v22_v9 }
  0x2a   :  { %135 = vmatpush.xpose.msk.msra.mxu0 %vm36_vm0, %v21_v10 }
  0x2e   :  { %136 = vmatpush.xpose.msk.msra.mxu0 %vm36_vm0, %v20_v11 }
  0x32   :  { %137 = vmatpush.xpose.msk.msra.mxu0 %vm36_vm0, %v19_v12 }
  0x36   :  { %138 = vmatpush.xpose.msk.msra.mxu0 %vm36_vm0, %v18_v13 }
  0x3a   :  { %139 = vmatpush.xpose.msk.msra.mxu0 %vm36_vm0, %v17_v14 }
  0x3e   :  { %140 = vmatpush.xpose.msk.msra.mxu0 %vm36_vm0, %v16_v15 }
  0x41   :  { %141 = vmatmul.msk.f32.vlgmr.msra.gmra.mxu0 %vm36_vm0, %v15_v16 }
  0xbe   :  { %v105_v18 = vpop.f32.mrf.mxu0 }
  0xbf   :  { %v106_v19 = vadd.f32 %v143_v17, %v105_v18 }
  0xc1   :  { %108 = vst [vmem:[#allocation2] sm:$0xff] %v106_v19 }
  0xc2   :  { %119 = dma.vmem_to_hbm [thread:$0]  %s115_s22, 128, %s117_s25, [#allocation3]  }
  0xc3   :  { %168 = dma.done.wait [#allocation3], 128  }
  0xc4   :  { %169 = vsyncadd [#allocation3], 4294967168 }
  0xc5   :  { %124 = vsyncpa [#allocation3], 1 }

</bundles_post_ra>
